<compile_context>
chip_gen: v7x
topology: tpu7x:2x2x1
jax: 0.10.0
libtpu: 0.0.40
codegen_flags: <defaults>
</compile_context>

<pallas_src>
import functools

import jax
import jax.numpy as jnp
from jax import lax
from jax.experimental import pallas as pl
from jax.experimental.pallas import tpu as pltpu


def _kl_mutual_kernel(p1_ref, p2_ref, out_ref, *, tile_n, n_rows):
    """One row tile: per-row KL(softmax(pred2) || softmax(pred1)), masked tail."""
    i = pl.program_id(0)

    x1 = p1_ref[...].astype(jnp.float32)   # (TILE_N, C) "student" logits
    x2 = p2_ref[...].astype(jnp.float32)   # (TILE_N, C) "teacher" logits (detached)

    # Stable shifted-softmax pieces.
    z1 = x1 - jnp.max(x1, axis=-1, keepdims=True)
    s1 = jnp.sum(jnp.exp(z1), axis=-1, keepdims=True)          # (T, 1)

    z2 = x2 - jnp.max(x2, axis=-1, keepdims=True)
    e2 = jnp.exp(z2)
    s2 = jnp.sum(e2, axis=-1, keepdims=True)                    # (T, 1)

    # Fused per-row KL (uses sum_c softmax(pred2) == 1):
    #   kl_row = (1/s2) * sum_c e2*(z2 - z1) + log(s1/s2)
    num = jnp.sum(e2 * (z2 - z1), axis=-1, keepdims=True)       # (T, 1)
    kl_row = num * pl.reciprocal(s2, approx=True) + jnp.log(s1 / s2)

    # Zero padded tail rows of the last (partial) tile BEFORE any downstream
    # sum: the padded rows may hold garbage/NaN, and jnp.where does not
    # propagate NaN from the unselected branch.
    row_ids = i * tile_n + lax.broadcasted_iota(jnp.int32, kl_row.shape, 0)
    kl_row = jnp.where(row_ids < n_rows, kl_row, 0.0)

    out_ref[...] = kl_row

    # TODO(synk): if a v7x bundle dump shows the VALU slot saturating with both
    # cores busy, offload the three lane sums to the idle MXU (dot against a
    # ones column) and keep the (x - max) elementwise math in bf16.


def _vmem_capacity_bytes() -> int:
    try:
        return int(pltpu.get_tpu_info().vmem_capacity_bytes)
    except Exception:
        return 64 * 1024 * 1024   # conservative (v7x-sized) fallback


def _pick_tile_n(n: int, c: int, itemsize: int, vmem_budget: int) -> int:
    """Rows per tile, sized by bytes: aim for multi-MiB input blocks.

    Accounts for lane padding of C to a multiple of 128 and for ~4 f32
    in-kernel tile temporaries on top of the double-buffered input blocks.
    """
    c_pad = max(-(-c // 128) * 128, 128)
    bytes_per_row = c_pad * (2 * 2 * itemsize + 4 * 4)   # 2 inputs x 2 bufs + 4 f32 temps
    tile = vmem_budget // max(bytes_per_row, 1)
    tile = max(16, (tile // 16) * 16)                    # sublane-friendly (f32 & bf16)
    # Small problems: take the whole array as one block (full-extent block
    # needs no 8-row alignment).
    return n if n <= tile else tile


def _kl_mutual_loss_xla(pred1: jax.Array, pred2: jax.Array) -> jax.Array:
    """Plain-XLA reference / tiny-shape fallback."""
    logp1 = jax.nn.log_softmax(pred1.astype(jnp.float32), axis=1)
    logp2 = jax.nn.log_softmax(pred2.astype(jnp.float32), axis=1)
    p2 = jnp.exp(logp2)
    return jnp.sum(p2 * (logp2 - logp1))


def _kl_mutual_loss_pallas(pred1: jax.Array, pred2: jax.Array,
                           tile_n: int | None = None) -> jax.Array:
    n, c = pred1.shape
    itemsize = max(pred1.dtype.itemsize, pred2.dtype.itemsize)

    vmem_cap = _vmem_capacity_bytes()
    if vmem_cap >= 128 * 1024 * 1024:      # v5e / v6e: use the 128 MiB headroom
        budget, vmem_limit = 64 * 1024 * 1024, 96 * 1024 * 1024
    else:                                   # v7x: 64 MiB physical VMEM per TC
        budget, vmem_limit = 24 * 1024 * 1024, 48 * 1024 * 1024

    if tile_n is None:
        tile_n = _pick_tile_n(n, c, itemsize, budget)
    tile_n = min(tile_n, n)
    num_tiles = pl.cdiv(n, tile_n)

    kernel = functools.partial(_kl_mutual_kernel, tile_n=tile_n, n_rows=n)

    partials = pl.pallas_call(
        kernel,
        out_shape=jax.ShapeDtypeStruct((num_tiles * tile_n, 1), jnp.float32),
        grid_spec=pltpu.PrefetchScalarGridSpec(
            num_scalar_prefetch=0,
            grid=(num_tiles,),
            in_specs=[
                pl.BlockSpec((tile_n, c), lambda i: (i, 0)),
                pl.BlockSpec((tile_n, c), lambda i: (i, 0)),
            ],
            out_specs=pl.BlockSpec((tile_n, 1), lambda i: (i, 0)),
        ),
        compiler_params=pltpu.CompilerParams(
            # Independent per-tile outputs -> megacore sharding on v7x.
            dimension_semantics=("parallel",),
            vmem_limit_bytes=vmem_limit,
        ),
    )(pred1, pred2)

    # Tiny finishing reduction (tree sum) in the wrapper; padded rows are 0.
    return jnp.sum(partials)


def kl_mutual_loss(pred1: jax.Array, pred2: jax.Array, *,
                   use_pallas: bool | None = None,
                   tile_n: int | None = None) -> jax.Array:
    """Pallas TPU implementation of KLMutualLoss.forward (sum reduction).

    pred1 / pred2: (N, C) logits; softmax over the last (class) axis.
    Do NOT pre-cast to f32 in the caller: bf16 logits are consumed as-is and
    upcast in-kernel, halving HBM traffic.
    """
    assert pred1.shape == pred2.shape and pred1.ndim == 2
    n, c = pred1.shape
    if use_pallas is None:
        # Tiny heads (lane-underutilised, launch-overhead-bound) -> plain XLA.
        c_pad = max(-(-c // 128) * 128, 128)
        itemsize = max(pred1.dtype.itemsize, pred2.dtype.itemsize)
        use_pallas = 2 * n * c_pad * itemsize >= (1 << 20)
    if not use_pallas:
        return _kl_mutual_loss_xla(pred1, pred2)
    return _kl_mutual_loss_pallas(pred1, pred2, tile_n=tile_n)


if __name__ == "__main__":
    key = jax.random.PRNGKey(0)
    k1, k2, k3, k4 = jax.random.split(key, 4)

    # Case 1: module-sized demo (batch=8, classes=32), single-block Pallas path
    # (forced; the auto heuristic would hand something this tiny to XLA).
    p1 = jax.random.normal(k1, (8, 32), dtype=jnp.float32)
    p2 = jax.random.normal(k2, (8, 32), dtype=jnp.float32)
    loss = jax.block_until_ready(kl_mutual_loss(p1, p2, use_pallas=True))
    ref = jax.block_until_ready(_kl_mutual_loss_xla(p1, p2))
    assert jnp.allclose(loss, ref, rtol=2e-3, atol=2e-3), (loss, ref)

    # Case 2: bf16 inputs, multi-tile "parallel" grid with a partial (masked)
    # last tile (N=50, TILE_N=16 -> 4 tiles, padded per-row output).
    q1 = jax.random.normal(k3, (50, 256), dtype=jnp.bfloat16)
    q2 = jax.random.normal(k4, (50, 256), dtype=jnp.bfloat16)
    loss2 = jax.block_until_ready(kl_mutual_loss(q1, q2, use_pallas=True, tile_n=16))
    ref2 = jax.block_until_ready(_kl_mutual_loss_xla(q1, q2))
    assert jnp.allclose(loss2, ref2, rtol=2e-3, atol=2e-2), (loss2, ref2)

    print("KERNEL_OK")
</pallas_src>

<mosaic_0001>
module attributes {stable_mosaic.version = 11 : i64} {
  func.func @_kl_mutual_kernel(%arg0: i32, %arg1: memref<8x32xf32, #tpu.memory_space<vmem>>, %arg2: memref<8x32xf32, #tpu.memory_space<vmem>>, %arg3: memref<8x1xf32, #tpu.memory_space<vmem>>) attributes {dimension_semantics = [#tpu.dimension_semantics<parallel>], iteration_bounds = array<i64: 1>, scalar_prefetch = 0 : i64, scratch_operands = 0 : i64, tpu.core_type = #tpu.core_type<tc>, window_params = [{transform_indices = @transform_0, window_bounds = array<i64: 8, 32>}, {transform_indices = @transform_1, window_bounds = array<i64: 8, 32>}, {transform_indices = @transform_2, window_bounds = array<i64: 8, 1>}]} {
    %c0 = arith.constant 0 : index
    %c0_0 = arith.constant 0 : index
    %0 = vector.load %arg1[%c0, %c0_0] : memref<8x32xf32, #tpu.memory_space<vmem>>, vector<8x32xf32>
    %c0_1 = arith.constant 0 : index
    %c0_2 = arith.constant 0 : index
    %1 = vector.load %arg2[%c0_1, %c0_2] : memref<8x32xf32, #tpu.memory_space<vmem>>, vector<8x32xf32>
    %cst = arith.constant dense<0xFF800000> : vector<8xf32>
    %2 = vector.multi_reduction <maximumf>, %0, %cst [1] : vector<8x32xf32> to vector<8xf32>
    %3 = vector.shape_cast %2 : vector<8xf32> to vector<8x1xf32>
    %4 = vector.broadcast %3 : vector<8x1xf32> to vector<8x32xf32>
    %5 = arith.subf %0, %4 : vector<8x32xf32>
    %6 = math.exp %5 : vector<8x32xf32>
    %cst_3 = arith.constant dense<0.000000e+00> : vector<8xf32>
    %7 = vector.multi_reduction <add>, %6, %cst_3 [1] : vector<8x32xf32> to vector<8xf32>
    %8 = vector.shape_cast %7 : vector<8xf32> to vector<8x1xf32>
    %cst_4 = arith.constant dense<0xFF800000> : vector<8xf32>
    %9 = vector.multi_reduction <maximumf>, %1, %cst_4 [1] : vector<8x32xf32> to vector<8xf32>
    %10 = vector.shape_cast %9 : vector<8xf32> to vector<8x1xf32>
    %11 = vector.broadcast %10 : vector<8x1xf32> to vector<8x32xf32>
    %12 = arith.subf %1, %11 : vector<8x32xf32>
    %13 = math.exp %12 : vector<8x32xf32>
    %cst_5 = arith.constant dense<0.000000e+00> : vector<8xf32>
    %14 = vector.multi_reduction <add>, %13, %cst_5 [1] : vector<8x32xf32> to vector<8xf32>
    %15 = vector.shape_cast %14 : vector<8xf32> to vector<8x1xf32>
    %16 = arith.subf %12, %5 : vector<8x32xf32>
    %17 = arith.mulf %13, %16 : vector<8x32xf32>
    %cst_6 = arith.constant dense<0.000000e+00> : vector<8xf32>
    %18 = vector.multi_reduction <add>, %17, %cst_6 [1] : vector<8x32xf32> to vector<8xf32>
    %19 = vector.shape_cast %18 : vector<8xf32> to vector<8x1xf32>
    %20 = tpu.reciprocal %15 {approx = true} : vector<8x1xf32> -> vector<8x1xf32>
    %21 = arith.mulf %19, %20 : vector<8x1xf32>
    %22 = arith.divf %8, %15 : vector<8x1xf32>
    %23 = math.log %22 : vector<8x1xf32>
    %24 = arith.addf %21, %23 : vector<8x1xf32>
    %c8_i32 = arith.constant 8 : i32
    %25 = arith.muli %arg0, %c8_i32 : i32
    %26 = tpu.iota {dimensions = array<i32: 0>} : vector<8x1xi32>
    %27 = vector.broadcast %25 : i32 to vector<8x1xi32>
    %28 = arith.addi %27, %26 : vector<8x1xi32>
    %c8_i32_7 = arith.constant 8 : i32
    %29 = vector.broadcast %c8_i32_7 : i32 to vector<8x1xi32>
    %30 = arith.cmpi slt, %28, %29 : vector<8x1xi32>
    %cst_8 = arith.constant 0.000000e+00 : f32
    %31 = vector.broadcast %cst_8 : f32 to vector<8x1xf32>
    %32 = arith.select %30, %24, %31 : vector<8x1xi1>, vector<8x1xf32>
    %c0_9 = arith.constant 0 : index
    %c0_10 = arith.constant 0 : index
    %33 = vector.load %arg3[%c0_9, %c0_10] : memref<8x1xf32, #tpu.memory_space<vmem>>, vector<8x1xf32>
    tpu.vector_store %arg3[%c0_9, %c0_10], %32 {strides = array<i32>} : memref<8x1xf32, #tpu.memory_space<vmem>>, vector<8x1xf32>,
    return
  }
  func.func @transform_0(%arg0: i32) -> (i32, i32) {
    %c0_i32 = arith.constant 0 : i32
    %c0_i32_0 = arith.constant 0 : i32
    return %arg0, %c0_i32 : i32, i32
  }
  func.func @transform_1(%arg0: i32) -> (i32, i32) {
    %c0_i32 = arith.constant 0 : i32
    %c0_i32_0 = arith.constant 0 : i32
    return %arg0, %c0_i32 : i32, i32
  }
  func.func @transform_2(%arg0: i32) -> (i32, i32) {
    %c0_i32 = arith.constant 0 : i32
    %c0_i32_0 = arith.constant 0 : i32
    return %arg0, %c0_i32 : i32, i32
  }
}

</mosaic_0001>

<bundles_post_ra>
// kernel: tpu_custom_call.1
= control target key start
LH: loop header
LB: loop body
LE: loop exit
PB: predicated region body
PF: predicated region fallthrough
CT: control target
= control target key end

     0   :  { %7 = vsyncpa [#allocation3], 0  ;;  %s190_s0 = inlined_call_operand.hbm [shape: f32[8,32], index: 0, kind: input, shape index: {}]   ;;  %s191_s1 = inlined_call_operand.hbm [shape: f32[8,32], index: 1, kind: input, shape index: {}]   ;;  %s192_s2 = inlined_call_operand.vmem [shape: f32[8,1], index: 2, kind: output, shape index: {}]  }
   0x1   :  { %8 = vsyncpa [#allocation5], 0  ;;  %s141_s9 = smov [#allocation2]   ;;  %s142_s11 = smov [#allocation4]  }
   0x2   :  { %s15_s10 = sshll.u32 %s141_s9, 4  ;;  %s25_s12 = sshll.u32 %s142_s11, 4  ;;  %s16_s10 = int_to_ptr.vmem [resolvable:$true] %s15_s10  ;;  %s26_s12 = int_to_ptr.vmem [resolvable:$true] %s25_s12 }
   0x3   :  { %s93_s15 = scalar_lea.hbm %s190_s0, 128 }
   0x4   :  { %p94_p0 = scmp.ne.s32.totalorder %s190_s0, %s93_s15  ;;  %p97_p1 = scmp.lt.u32.totalorder %s93_s15, %s190_s0 }
   0x6   :  { %p99_p2 = pnand %p97_p1, %p94_p0 }
   0x8   :  { %102 = shalt.err (!%p99_p2)
}
   0x9   :  { %s103_s20 = scalar_lea.vmem %s16_s10, 128  ;;  %p108_p4 = scmp.lt.s32.totalorder %s16_s10, %s16_s10 }
   0xa   :  { %p104_p3 = scmp.ne.s32.totalorder %s16_s10, %s103_s20  ;;  %p109_p5 = scmp.lt.s32.totalorder %s103_s20, %s103_s20 }
   0xc   :  { %p110_p6 = por %p109_p5, %p108_p4 }
   0xe   :  { %p111_p7 = pnand %p110_p6, %p104_p3 }
  0x10   :  { %114 = shalt.err (!%p111_p7)
}
  0x11   :  { %18 = dma.hbm_to_vmem [thread:$0]  %s190_s0, 128, %s16_s10, [#allocation3]  }
  0x12   :  { %s115_s25 = scalar_lea.hbm %s191_s1, 128 }
  0x13   :  { %p116_p8 = scmp.ne.s32.totalorder %s191_s1, %s115_s25  ;;  %p119_p9 = scmp.lt.u32.totalorder %s115_s25, %s191_s1 }
  0x15   :  { %p121_p10 = pnand %p119_p9, %p116_p8 }
  0x17   :  { %124 = shalt.err (!%p121_p10)
}
  0x18   :  { %s125_s30 = scalar_lea.vmem %s26_s12, 128  ;;  %p130_p12 = scmp.lt.s32.totalorder %s26_s12, %s26_s12 }
  0x19   :  { %p126_p11 = scmp.ne.s32.totalorder %s26_s12, %s125_s30  ;;  %p131_p13 = scmp.lt.s32.totalorder %s125_s30, %s125_s30 }
  0x1b   :  { %p132_p0 = por %p131_p13, %p130_p12 }
  0x1d   :  { %p133_p1 = pnand %p132_p0, %p126_p11 }
  0x1f   :  { %136 = shalt.err (!%p133_p1)
}
  0x20   :  { %28 = dma.hbm_to_vmem [thread:$0]  %s191_s1, 128, %s26_s12, [#allocation5]  }
  0x21   :  { %137 = dma.done.wait [#allocation3], 128  }
  0x22   :  { %138 = vsyncadd [#allocation3], 4294967168 }
  0x23   :  { %139 = dma.done.wait [#allocation5], 128  }
  0x24   :  { %140 = vsyncadd [#allocation5], 4294967168  ;;  %vm37_vm0 = vcmask 261120   ;;  %v36_v0 = vld [vmem:[#allocation4] sm:$0xff]  ;;  %v35_v1 = vld [vmem:[#allocation2] sm:$0xff]  ;;  %vm75_vm1 = vcmask 7168  }
  0x25   :  { %v47_v2 = vsel %vm37_vm0, %v36_v0, -inf  ;;  %v38_v3 = vsel %vm37_vm0, %v35_v1, -inf }
  0x26   :  { %48 = vmax.xlane.f32.xlu0 %v47_v2 }
  0x2a   :  { %39 = vmax.xlane.f32.xlu0 %v38_v3 }
  0xb3   :  { %v49_v4 = vpop.xlane.xlu0 %48 }
  0xb4   :  { %v50_v5 = vsub.f32 %v36_v0, %v49_v4 }
  0xb6   :  { %v51_v6 = vmul.f32 1.442695, %v50_v5 }
  0xb7   :  { %v40_v7 = vpop.xlane.xlu0 %39 }
  0xb8   :  { %85 = vpow2.f32 %v51_v6  ;;  %v41_v8 = vsub.f32 %v35_v1, %v40_v7 }
  0xba   :  { %v42_v9 = vmul.f32 1.442695, %v41_v8  ;;  %v56_v10 = vsub.f32 %v50_v5, %v41_v8 }
  0xbc   :  { %87 = vpow2.f32 %v42_v9 }
  0xc2   :  { %v86_v11 = vpop.eup %85 }
  0xc3   :  { %v53_v12 = vsel %vm37_vm0, %v86_v11, 0.0  ;;  %v57_v13 = vmul.f32 %v86_v11, %v56_v10 }
  0xc4   :  { %54 = vadd.xlane.f32.xlu1 %v53_v12 }
  0xc5   :  { %v58_v14 = vsel %vm37_vm0, %v57_v13, 0.0 }
  0xc6   :  { %v88_v15 = vpop.eup %87  ;;  %59 = vadd.xlane.f32.xlu0 %v58_v14 }
  0xc7   :  { %v44_v16 = vsel %vm37_vm0, %v88_v15, 0.0 }
  0xc8   :  { %45 = vadd.xlane.f32.xlu1 %v44_v16 }
 0x151   :  { %v55_v17 = vpop.xlane.xlu1 %54 }
 0x152   :  { %89 = vrcp.f32 %v55_v17 }
 0x153   :  { %v60_v22 = vpop.xlane.xlu0 %59 }
 0x155   :  { %v46_v18 = vpop.xlane.xlu1 %45 }
 0x15c   :  { %v90_v19 = vpop.eup %89 }
 0x15d   :  { %v64_v20 = vmul.f32 %v90_v19, %v46_v18  ;;  %v62_v23 = vmul.f32 %v90_v19, %v60_v22 }
 0x15f   :  { %91 = vlog2.f32 %v64_v20 }
 0x169   :  { %v92_v21 = vpop.eup %91 }
 0x16a   :  { %v66_v24 = vmul.f32 0.6931472, %v92_v21 }
 0x16c   :  { %v67_v25 = vadd.f32 %v66_v24, %v62_v23 }
 0x16e   :  { %76 = vst.msk [vmem:[%s192_s2] sm:$0xff] %vm75_vm1, %v67_v25 }
 0x16f   :  { %81 = vsyncpa [#allocation3], 1 }
 0x170   :  { %82 = vsyncpa [#allocation5], 1 }

</bundles_post_ra>
